<compile_context>
chip_gen: v7x
topology: tpu7x:2x2x1
jax: 0.10.0
libtpu: 0.0.40
codegen_flags: <defaults>
</compile_context>

<pallas_src>
import jax
import jax.numpy as jnp
from jax.experimental import pallas as pl
from jax.experimental.pallas import tpu as pltpu


def linear_kernel(x_ref, wb_ref, o_ref):
    # x_ref : (B, K) f32 in VMEM
    # wb_ref: (K+1,) f32 in SMEM  -- [w0, w1, ..., w_{K-1}, bias]
    # o_ref : (B, 1) f32 in VMEM
    x = x_ref[...]                                   # (B, K)
    K = x.shape[-1]

    # Rebuild the (1, K) weight row from SMEM scalars: lane-iota + select splat.
    lane = jax.lax.broadcasted_iota(jnp.int32, (1, K), 1)
    w = jnp.zeros((1, K), dtype=x.dtype)
    for k in range(K):                               # K == 4, fully unrolled
        w = jnp.where(lane == k, wb_ref[k], w)

    b = wb_ref[K]                                    # scalar bias from SMEM

    # VPU broadcast-multiply + small XLU lane reduce; no MXU involvement.
    acc = jnp.sum(x * w, axis=-1, keepdims=True)     # (B, 1) f32
    o_ref[...] = (acc + b).astype(o_ref.dtype)


def _linear_pallas(x, weight, bias):
    """x: (B, in), weight: (out, in) [PyTorch convention], bias: (out,). out == 1."""
    B, K = x.shape
    N, K2 = weight.shape
    assert N == 1 and K2 == K, "kernel specialized for nn.Linear(4, 1)"

    # Single small scalar operand: [w..., b] -> (K+1,) f32 in SMEM (pads to 32 B).
    wb = jnp.concatenate(
        [weight.reshape(-1).astype(jnp.float32), bias.reshape(-1).astype(jnp.float32)]
    )

    return pl.pallas_call(
        linear_kernel,
        out_shape=jax.ShapeDtypeStruct((B, N), x.dtype),
        in_specs=[
            pl.BlockSpec(memory_space=pltpu.MemorySpace.VMEM),   # x
            pl.BlockSpec(memory_space=pltpu.MemorySpace.SMEM),   # [weight, bias]
        ],
        out_specs=pl.BlockSpec(memory_space=pltpu.MemorySpace.VMEM),
    )(x, wb)


# Jitted entry point: the pallas_call is compiled/fused into the surrounding
# graph instead of being dispatched eagerly per call.
linear_pallas = jax.jit(_linear_pallas)


if __name__ == "__main__":
    key = jax.random.PRNGKey(0)
    kx, kw, kb = jax.random.split(key, 3)

    B, IN, OUT = 8, 4, 1
    x = jax.random.normal(kx, (B, IN), dtype=jnp.float32)

    # Deterministic parameter init (mimic nn.Linear's uniform(-1/sqrt(in), 1/sqrt(in)))
    bound = 1.0 / (IN ** 0.5)
    weight = jax.random.uniform(kw, (OUT, IN), minval=-bound, maxval=bound,
                                dtype=jnp.float32)
    bias = jax.random.uniform(kb, (OUT,), minval=-bound, maxval=bound,
                              dtype=jnp.float32)

    out = linear_pallas(x, weight, bias)
    jax.block_until_ready(out)

    # Reference check against plain JAX (same math as PyTorch nn.Linear)
    ref = x @ weight.T + bias
    assert out.shape == (B, OUT)
    assert jnp.allclose(out, ref, atol=1e-5), "mismatch vs reference"

    print("KERNEL_OK")
</pallas_src>

<mosaic_0001>
module attributes {stable_mosaic.version = 11 : i64} {
  func.func @linear_kernel(%arg0: memref<8x4xf32, #tpu.memory_space<vmem>>, %arg1: memref<5xf32, #tpu.memory_space<smem>>, %arg2: memref<8x1xf32, #tpu.memory_space<vmem>>) attributes {dimension_semantics = [], scalar_prefetch = 0 : i64, scratch_operands = 0 : i64, tpu.core_type = #tpu.core_type<tc>} {
    %c0 = arith.constant 0 : index
    %c0_0 = arith.constant 0 : index
    %0 = vector.load %arg0[%c0, %c0_0] : memref<8x4xf32, #tpu.memory_space<vmem>>, vector<8x4xf32>
    %1 = tpu.iota {dimensions = array<i32: 1>} : vector<1x4xi32>
    %cst = arith.constant 0.000000e+00 : f32
    %2 = vector.broadcast %cst : f32 to vector<1x4xf32>
    %c0_i32 = arith.constant 0 : i32
    %3 = vector.broadcast %c0_i32 : i32 to vector<1x4xi32>
    %4 = arith.cmpi eq, %1, %3 : vector<1x4xi32>
    %c0_1 = arith.constant 0 : index
    %5 = memref.load %arg1[%c0_1] : memref<5xf32, #tpu.memory_space<smem>>
    %6 = vector.broadcast %5 : f32 to vector<1x4xf32>
    %7 = arith.select %4, %6, %2 : vector<1x4xi1>, vector<1x4xf32>
    %c1_i32 = arith.constant 1 : i32
    %8 = vector.broadcast %c1_i32 : i32 to vector<1x4xi32>
    %9 = arith.cmpi eq, %1, %8 : vector<1x4xi32>
    %c1 = arith.constant 1 : index
    %10 = memref.load %arg1[%c1] : memref<5xf32, #tpu.memory_space<smem>>
    %11 = vector.broadcast %10 : f32 to vector<1x4xf32>
    %12 = arith.select %9, %11, %7 : vector<1x4xi1>, vector<1x4xf32>
    %c2_i32 = arith.constant 2 : i32
    %13 = vector.broadcast %c2_i32 : i32 to vector<1x4xi32>
    %14 = arith.cmpi eq, %1, %13 : vector<1x4xi32>
    %c2 = arith.constant 2 : index
    %15 = memref.load %arg1[%c2] : memref<5xf32, #tpu.memory_space<smem>>
    %16 = vector.broadcast %15 : f32 to vector<1x4xf32>
    %17 = arith.select %14, %16, %12 : vector<1x4xi1>, vector<1x4xf32>
    %c3_i32 = arith.constant 3 : i32
    %18 = vector.broadcast %c3_i32 : i32 to vector<1x4xi32>
    %19 = arith.cmpi eq, %1, %18 : vector<1x4xi32>
    %c3 = arith.constant 3 : index
    %20 = memref.load %arg1[%c3] : memref<5xf32, #tpu.memory_space<smem>>
    %21 = vector.broadcast %20 : f32 to vector<1x4xf32>
    %22 = arith.select %19, %21, %17 : vector<1x4xi1>, vector<1x4xf32>
    %c4 = arith.constant 4 : index
    %23 = memref.load %arg1[%c4] : memref<5xf32, #tpu.memory_space<smem>>
    %24 = vector.broadcast %22 : vector<1x4xf32> to vector<8x4xf32>
    %25 = arith.mulf %0, %24 : vector<8x4xf32>
    %cst_2 = arith.constant dense<0.000000e+00> : vector<8xf32>
    %26 = vector.multi_reduction <add>, %25, %cst_2 [1] : vector<8x4xf32> to vector<8xf32>
    %27 = vector.shape_cast %26 : vector<8xf32> to vector<8x1xf32>
    %28 = vector.broadcast %23 : f32 to vector<8x1xf32>
    %29 = arith.addf %27, %28 : vector<8x1xf32>
    %c0_3 = arith.constant 0 : index
    %c0_4 = arith.constant 0 : index
    %30 = vector.load %arg2[%c0_3, %c0_4] : memref<8x1xf32, #tpu.memory_space<vmem>>, vector<8x1xf32>
    tpu.vector_store %arg2[%c0_3, %c0_4], %29 {strides = array<i32>} : memref<8x1xf32, #tpu.memory_space<vmem>>, vector<8x1xf32>,
    return
  }
}

</mosaic_0001>

<bundles_post_ra>
// kernel: _linear_pallas.1
= control target key start
LH: loop header
LB: loop body
LE: loop exit
PB: predicated region body
PF: predicated region fallthrough
CT: control target
= control target key end

     0   :  { %7 = vsyncpa [#allocation3], 0  ;;  %s102_s0 = inlined_call_operand.vmem [shape: f32[8,4], index: 0, kind: input, shape index: {}]   ;;  %s103_s1 = inlined_call_operand.vmem [shape: f32[5], index: 1, kind: input, shape index: {}]   ;;  %s104_s2 = inlined_call_operand.vmem [shape: f32[8,1], index: 2, kind: output, shape index: {}]  }
   0x1   :  { %s16_s11 = sshll.u32 %s103_s1, 4  ;;  %s17_s11 = int_to_ptr.vmem [resolvable:$true] %s16_s11 }
   0x2   :  { %s63_s12 = scalar_lea.vmem %s17_s11, 16  ;;  %p68_p1 = scmp.lt.s32.totalorder %s17_s11, %s17_s11 }
   0x3   :  { %p64_p0 = scmp.ne.s32.totalorder %s17_s11, %s63_s12  ;;  %p69_p2 = scmp.lt.s32.totalorder %s63_s12, %s63_s12 }
   0x5   :  { %p70_p3 = por %p69_p2, %p68_p1 }
   0x7   :  { %p71_p4 = pnand %p70_p3, %p64_p0 }
   0x9   :  { %74 = shalt.err (!%p71_p4)
}
   0xa   :  { %s77_s13 = smov [#allocation2]  }
   0xb   :  { %19 = dma.vmem_to_smem %s17_s11, 16, %s77_s13, [#allocation3]  }
   0xc   :  { %75 = dma.done.wait [#allocation3], 16  }
   0xd   :  { %76 = vsyncadd [#allocation3], 4294967280 }
   0xe   :  { %23 = sfence }
   0xf   :  { %v25_v0 = vlaneseq  ;;  %s28_s14 = sld [smem:[#allocation2]]  ;;  %s58_s15 = sld [smem:[#allocation2 + $0x1]]  ;;  %v24_v7 = vld [vmem:[%s102_s0] sm:$0xff]  ;;  %vm45_vm4 = vcmask 31744   ;;  %vm51_vm5 = vcmask 7168  }
  0x10   :  { %s59_s16 = sld [smem:[#allocation2 + $0x2]]  ;;  %s60_s17 = sld [smem:[#allocation2 + $0x3]] }
  0x11   :  { %v26_v1 = vand.u32 127, %v25_v0  ;;  %s61_s19 = sld [smem:[#allocation2 + $0x4]] }
  0x13   :  { %vm27_vm0 = vcmp.eq.s32.totalorder %v26_v1, 0  ;;  %vm31_vm1 = vcmp.eq.s32.totalorder %v26_v1, 1  ;;  %vm35_vm2 = vcmp.eq.s32.totalorder %v26_v1, 2  ;;  %vm39_vm3 = vcmp.eq.s32.totalorder %v26_v1, 3 }
  0x15   :  { %v29_v2 = vstv %s28_s14  ;;  %v33_v3 = vstv %s58_s15 }
  0x16   :  { %v30_v4 = vsel %vm27_vm0, %v29_v2, 0.0  ;;  %v37_v5 = vstv %s59_s16  ;;  %v41_v6 = vstv %s60_s17 }
  0x17   :  { %v34_v8 = vsel %vm31_vm1, %v33_v3, %v30_v4  ;;  %v49_v13 = vstv %s61_s19 }
  0x18   :  { %v38_v9 = vsel %vm35_vm2, %v37_v5, %v34_v8 }
  0x19   :  { %v42_v10 = vsel %vm39_vm3, %v41_v6, %v38_v9 }
  0x1a   :  { %v44_v11 = vmul.f32 %v42_v10, %v24_v7 }
  0x1c   :  { %v46_v12 = vsel %vm45_vm4, %v44_v11, 0.0 }
  0x1d   :  { %47 = vadd.xlane.f32.xlu0 %v46_v12 }
  0xaa   :  { %v48_v14 = vpop.xlane.xlu0 %47 }
  0xab   :  { %v50_v15 = vadd.f32 %v49_v13, %v48_v14 }
  0xad   :  { %52 = vst.msk [vmem:[%s104_s2] sm:$0xff] %vm51_vm5, %v50_v15 }
  0xae   :  { %57 = vsyncpa [#allocation3], 1 }

</bundles_post_ra>
